<compile_context>
chip_gen: v7x
topology: tpu7x:2x2x1
jax: 0.10.0
libtpu: 0.0.40
codegen_flags: <defaults>
</compile_context>

<pallas_src>
import functools

import jax
import jax.numpy as jnp
from jax import lax
from jax.experimental import pallas as pl
from jax.experimental.pallas import tpu as pltpu

NUM_STATE = 28
NUM_ACTION = 5
HIDDEN = 100

_LANE = 128
_DEFAULT_TILE_B = 4096  # multiple of 128; ~7 MiB VMEM double-buffered


def _round_up(v, m):
    return ((v + m - 1) // m) * m


def actor_kernel(x_ref, w1_ref, b1_ref, w2_ref, b2_ref, out_ref):
    # In-kernel bf16 casts (cheap VPU work) feed the native bf16 MXU path;
    # all accumulation and the softmax stay in f32.
    x = x_ref[...].astype(jnp.bfloat16)        # (TILE_B, 28)
    w1 = w1_ref[...].astype(jnp.bfloat16)      # (28, 100)
    w2 = w2_ref[...].astype(jnp.bfloat16)      # (100, 5)
    b1 = b1_ref[...]                           # (1, 100)      f32
    b2 = b2_ref[...]                           # (5, 1)        f32

    # fc1 + ReLU.
    h = jnp.dot(x, w1, preferred_element_type=jnp.float32) + b1   # (TILE_B, 100)
    h = jnp.maximum(h, 0.0)

    # action_head, computed feature-major: (NUM_ACTION, TILE_B) so the softmax
    # and the store are lane-dense (batch on the 128-wide lane axis).
    logits_t = lax.dot_general(
        w2, h.astype(jnp.bfloat16),
        dimension_numbers=(((0,), (1,)), ((), ())),
        preferred_element_type=jnp.float32) + b2                   # (5, TILE_B)

    # Numerically-stable softmax over the action axis (sublanes), exact divide
    # so each row sums to 1 to f32 rounding.
    m = jnp.max(logits_t, axis=0, keepdims=True)                   # (1, TILE_B)
    e = jnp.exp(logits_t - m)
    denom = jnp.sum(e, axis=0, keepdims=True)
    out_ref[...] = (e / denom).astype(out_ref.dtype)


@functools.partial(jax.jit, static_argnames=("tile_b",))
def actor_forward(x, w1, b1, w2, b2, tile_b=None):
    B = x.shape[0]

    # Tile sizing: lane-aligned (multiple of 128, required by the transposed
    # (NUM_ACTION, tile_b) output block); when auto-sizing, also cap so large
    # batches give >=4 grid steps for v7x's two TensorCores.
    if tile_b is None:
        tile_b = min(_DEFAULT_TILE_B, _round_up(pl.cdiv(B, 4), _LANE))
    tile_b = max(_LANE, _round_up(tile_b, _LANE))
    Bp = _round_up(B, tile_b)

    # Ragged batch: zero-pad rows (softmax of a zero row is finite; padded
    # rows are sliced off below). Pad fuses under jit.
    xp = jnp.pad(x, ((0, Bp - B), (0, 0))) if Bp != B else x
    b2t = jnp.reshape(b2, (NUM_ACTION, 1))

    grid = (Bp // tile_b,)

    cost = pl.CostEstimate(
        flops=2 * Bp * (NUM_STATE * HIDDEN + HIDDEN * NUM_ACTION),
        transcendentals=Bp * NUM_ACTION,
        bytes_accessed=(Bp * NUM_STATE * 4                 # x (f32)
                        + NUM_STATE * HIDDEN * 4           # w1
                        + HIDDEN * 4                       # b1
                        + HIDDEN * NUM_ACTION * 4          # w2
                        + NUM_ACTION * 4                   # b2
                        + NUM_ACTION * Bp * 4))            # out (f32)

    out_t = pl.pallas_call(
        actor_kernel,
        out_shape=jax.ShapeDtypeStruct((NUM_ACTION, Bp), jnp.float32),
        grid=grid,
        in_specs=[
            pl.BlockSpec((tile_b, NUM_STATE), lambda i: (i, 0)),    # x tile
            pl.BlockSpec((NUM_STATE, HIDDEN), lambda i: (0, 0)),    # w1 resident
            pl.BlockSpec((1, HIDDEN), lambda i: (0, 0)),            # b1 resident
            pl.BlockSpec((HIDDEN, NUM_ACTION), lambda i: (0, 0)),   # w2 resident
            pl.BlockSpec((NUM_ACTION, 1), lambda i: (0, 0)),        # b2 resident
        ],
        # Lane-dense output: batch on the lane axis, unmasked vst.
        out_specs=pl.BlockSpec((NUM_ACTION, tile_b), lambda i: (0, i)),
        compiler_params=pltpu.CompilerParams(
            dimension_semantics=("parallel",)),
        cost_estimate=cost,
    )(xp, w1, b1, w2, b2t)

    # Back to the PyTorch layout (B, NUM_ACTION); transpose+slice fuse under jit.
    return out_t.T[:B]


def init_params(key):
    # Deterministic init mimicking PyTorch nn.Linear default:
    # U(-1/sqrt(fan_in), 1/sqrt(fan_in)) for weights and biases.
    k1, k2, k3, k4 = jax.random.split(key, 4)
    bound1 = 1.0 / jnp.sqrt(NUM_STATE)
    bound2 = 1.0 / jnp.sqrt(HIDDEN)
    # Stored as (in_features, out_features) — transposed vs. PyTorch storage.
    w1 = jax.random.uniform(k1, (NUM_STATE, HIDDEN), jnp.float32, -bound1, bound1)
    b1 = jax.random.uniform(k2, (1, HIDDEN), jnp.float32, -bound1, bound1)
    w2 = jax.random.uniform(k3, (HIDDEN, NUM_ACTION), jnp.float32, -bound2, bound2)
    b2 = jax.random.uniform(k4, (1, NUM_ACTION), jnp.float32, -bound2, bound2)
    return w1, b1, w2, b2


def _reference_bf16(x, w1, b1, w2, b2):
    # Mirrors the kernel's bf16-matmul / f32-accumulate path with exact softmax.
    h = jnp.dot(x.astype(jnp.bfloat16), w1.astype(jnp.bfloat16),
                preferred_element_type=jnp.float32) + b1
    h = jnp.maximum(h, 0.0)
    logits = jnp.dot(h.astype(jnp.bfloat16), w2.astype(jnp.bfloat16),
                     preferred_element_type=jnp.float32) + b2
    return jax.nn.softmax(logits, axis=1)


def _reference_f32(x, w1, b1, w2, b2):
    h = jnp.maximum(x @ w1 + b1, 0.0)
    return jax.nn.softmax(h @ w2 + b2, axis=1)


if __name__ == "__main__":
    key = jax.random.PRNGKey(0)
    kp, kx, kx2 = jax.random.split(key, 3)
    w1, b1, w2, b2 = init_params(kp)

    # Small primary test (single tile, padded 8 -> 128 rows internally).
    B = 8
    x = jax.random.normal(kx, (B, NUM_STATE), jnp.float32)
    probs = jax.block_until_ready(actor_forward(x, w1, b1, w2, b2))

    ref_bf = _reference_bf16(x, w1, b1, w2, b2)
    ref_f32 = _reference_f32(x, w1, b1, w2, b2)
    assert probs.shape == (B, NUM_ACTION)
    # Tight vs. a reference mirroring the kernel's bf16 matmuls; loose vs.
    # pure-f32 (bf16 mantissa on the matmul inputs).
    assert jnp.allclose(probs, ref_bf, atol=2e-3, rtol=2e-3)
    assert jnp.allclose(probs, ref_f32, atol=3e-2, rtol=3e-2)
    # Exact divide -> rows sum to 1 up to f32 rounding.
    assert jnp.allclose(jnp.sum(probs, axis=1), 1.0, atol=1e-5)

    # Multi-tile + ragged-batch path: B=300, tile_b=128 -> grid of 3, 84 padded rows.
    B2 = 300
    x2 = jax.random.normal(kx2, (B2, NUM_STATE), jnp.float32)
    probs2 = jax.block_until_ready(actor_forward(x2, w1, b1, w2, b2, tile_b=128))
    ref2 = _reference_bf16(x2, w1, b1, w2, b2)
    assert probs2.shape == (B2, NUM_ACTION)
    assert jnp.allclose(probs2, ref2, atol=2e-3, rtol=2e-3)
    assert jnp.allclose(jnp.sum(probs2, axis=1), 1.0, atol=1e-5)

    print("KERNEL_OK")
</pallas_src>

<mosaic_0001>
module attributes {stable_mosaic.version = 11 : i64} {
  func.func @actor_kernel(%arg0: i32, %arg1: memref<128x28xf32, #tpu.memory_space<vmem>>, %arg2: memref<28x100xf32, #tpu.memory_space<vmem>>, %arg3: memref<1x100xf32, #tpu.memory_space<vmem>>, %arg4: memref<100x5xf32, #tpu.memory_space<vmem>>, %arg5: memref<5x1xf32, #tpu.memory_space<vmem>>, %arg6: memref<5x128xf32, #tpu.memory_space<vmem>>) attributes {dimension_semantics = [#tpu.dimension_semantics<parallel>], iteration_bounds = array<i64: 1>, scalar_prefetch = 0 : i64, scratch_operands = 0 : i64, tpu.core_type = #tpu.core_type<tc>, window_params = [{transform_indices = @transform_0, window_bounds = array<i64: 128, 28>}, {pipeline_mode = #tpu.pipeline_mode<synchronous>, transform_indices = @transform_1, window_bounds = array<i64: 28, 100>}, {pipeline_mode = #tpu.pipeline_mode<synchronous>, transform_indices = @transform_2, window_bounds = array<i64: 1, 100>}, {pipeline_mode = #tpu.pipeline_mode<synchronous>, transform_indices = @transform_3, window_bounds = array<i64: 100, 5>}, {pipeline_mode = #tpu.pipeline_mode<synchronous>, transform_indices = @transform_4, window_bounds = array<i64: 5, 1>}, {transform_indices = @transform_5, window_bounds = array<i64: 5, 128>}]} {
    %c0 = arith.constant 0 : index
    %c0_0 = arith.constant 0 : index
    %0 = vector.load %arg1[%c0, %c0_0] : memref<128x28xf32, #tpu.memory_space<vmem>>, vector<128x28xf32>
    %1 = arith.truncf %0 : vector<128x28xf32> to vector<128x28xbf16>
    %c0_1 = arith.constant 0 : index
    %c0_2 = arith.constant 0 : index
    %2 = vector.load %arg2[%c0_1, %c0_2] : memref<28x100xf32, #tpu.memory_space<vmem>>, vector<28x100xf32>
    %3 = arith.truncf %2 : vector<28x100xf32> to vector<28x100xbf16>
    %c0_3 = arith.constant 0 : index
    %c0_4 = arith.constant 0 : index
    %4 = vector.load %arg4[%c0_3, %c0_4] : memref<100x5xf32, #tpu.memory_space<vmem>>, vector<100x5xf32>
    %5 = arith.truncf %4 : vector<100x5xf32> to vector<100x5xbf16>
    %c0_5 = arith.constant 0 : index
    %c0_6 = arith.constant 0 : index
    %6 = vector.load %arg3[%c0_5, %c0_6] : memref<1x100xf32, #tpu.memory_space<vmem>>, vector<1x100xf32>
    %c0_7 = arith.constant 0 : index
    %c0_8 = arith.constant 0 : index
    %7 = vector.load %arg5[%c0_7, %c0_8] : memref<5x1xf32, #tpu.memory_space<vmem>>, vector<5x1xf32>
    %cst = arith.constant dense<0.000000e+00> : vector<128x100xf32>
    %8 = tpu.matmul %1, %3, %cst {dimension_numbers = #tpu.dot_dimension_numbers<[1], [0], [0], [1], [0, 0, 1, 1], [], []>} : vector<128x28xbf16>, vector<28x100xbf16>, vector<128x100xf32> -> vector<128x100xf32>
    %9 = vector.broadcast %6 : vector<1x100xf32> to vector<128x100xf32>
    %10 = arith.addf %8, %9 : vector<128x100xf32>
    %cst_9 = arith.constant 0.000000e+00 : f32
    %11 = vector.broadcast %cst_9 : f32 to vector<128x100xf32>
    %12 = arith.maximumf %10, %11 : vector<128x100xf32>
    %13 = arith.truncf %12 : vector<128x100xf32> to vector<128x100xbf16>
    %cst_10 = arith.constant dense<0.000000e+00> : vector<5x128xf32>
    %14 = tpu.matmul %5, %13, %cst_10 {dimension_numbers = #tpu.dot_dimension_numbers<[0], [1], [1], [0], [0, 1, 1, 0], [], []>} : vector<100x5xbf16>, vector<128x100xbf16>, vector<5x128xf32> -> vector<5x128xf32>
    %15 = vector.broadcast %7 : vector<5x1xf32> to vector<5x128xf32>
    %16 = arith.addf %14, %15 : vector<5x128xf32>
    %cst_11 = arith.constant dense<0xFF800000> : vector<128xf32>
    %17 = vector.multi_reduction <maximumf>, %16, %cst_11 [0] : vector<5x128xf32> to vector<128xf32>
    %18 = vector.shape_cast %17 : vector<128xf32> to vector<1x128xf32>
    %19 = vector.broadcast %18 : vector<1x128xf32> to vector<5x128xf32>
    %20 = arith.subf %16, %19 : vector<5x128xf32>
    %21 = math.exp %20 : vector<5x128xf32>
    %cst_12 = arith.constant dense<0.000000e+00> : vector<128xf32>
    %22 = vector.multi_reduction <add>, %21, %cst_12 [0] : vector<5x128xf32> to vector<128xf32>
    %23 = vector.shape_cast %22 : vector<128xf32> to vector<1x128xf32>
    %24 = vector.broadcast %23 : vector<1x128xf32> to vector<5x128xf32>
    %25 = arith.divf %21, %24 : vector<5x128xf32>
    %c0_13 = arith.constant 0 : index
    %c0_14 = arith.constant 0 : index
    %26 = vector.load %arg6[%c0_13, %c0_14] : memref<5x128xf32, #tpu.memory_space<vmem>>, vector<5x128xf32>
    tpu.vector_store %arg6[%c0_13, %c0_14], %25 {strides = array<i32>} : memref<5x128xf32, #tpu.memory_space<vmem>>, vector<5x128xf32>,
    return
  }
  func.func @transform_0(%arg0: i32) -> (i32, i32) {
    %c0_i32 = arith.constant 0 : i32
    %c0_i32_0 = arith.constant 0 : i32
    return %arg0, %c0_i32 : i32, i32
  }
  func.func @transform_1(%arg0: i32) -> (i32, i32) {
    %c0_i32 = arith.constant 0 : i32
    %c0_i32_0 = arith.constant 0 : i32
    %c0_i32_1 = arith.constant 0 : i32
    return %c0_i32, %c0_i32_0 : i32, i32
  }
  func.func @transform_2(%arg0: i32) -> (i32, i32) {
    %c0_i32 = arith.constant 0 : i32
    %c0_i32_0 = arith.constant 0 : i32
    %c0_i32_1 = arith.constant 0 : i32
    return %c0_i32, %c0_i32_0 : i32, i32
  }
  func.func @transform_3(%arg0: i32) -> (i32, i32) {
    %c0_i32 = arith.constant 0 : i32
    %c0_i32_0 = arith.constant 0 : i32
    %c0_i32_1 = arith.constant 0 : i32
    return %c0_i32, %c0_i32_0 : i32, i32
  }
  func.func @transform_4(%arg0: i32) -> (i32, i32) {
    %c0_i32 = arith.constant 0 : i32
    %c0_i32_0 = arith.constant 0 : i32
    %c0_i32_1 = arith.constant 0 : i32
    return %c0_i32, %c0_i32_0 : i32, i32
  }
  func.func @transform_5(%arg0: i32) -> (i32, i32) {
    %c0_i32 = arith.constant 0 : i32
    %c0_i32_0 = arith.constant 0 : i32
    return %c0_i32, %arg0 : i32, i32
  }
}

</mosaic_0001>

<bundles_post_ra>
// kernel: actor_forward.1
= control target key start
LH: loop header
LB: loop body
LE: loop exit
PB: predicated region body
PF: predicated region fallthrough
CT: control target
= control target key end

     0   :  { %vm79_vm0 = vcmask 228352   ;;  %vm104_vm1 = vcmask 1045504   ;;  %v422_v51 = vmov 0.0   ;;  %vm423_vm2 = vmmov 0   ;;  %s591_s1 = inlined_call_operand.vmem [shape: f32[28,100], index: 1, kind: input, shape index: {}]   ;;  %s592_s0 = inlined_call_operand.vmem [shape: f32[128,28], index: 0, kind: input, shape index: {}]   ;;  %s593_s3 = inlined_call_operand.vmem [shape: f32[100,5], index: 3, kind: input, shape index: {}]   ;;  %s594_s4 = inlined_call_operand.vmem [shape: f32[5,1], index: 4, kind: input, shape index: {}]   ;;  %s595_s2 = inlined_call_operand.vmem [shape: f32[1,100], index: 2, kind: input, shape index: {}]   ;;  %s596_s5 = inlined_call_operand.vmem [shape: f32[5,128], index: 5, kind: output, shape index: {}]  }
   0x1   :  { %v45_v0 = vld [vmem:[%s591_s1] sm:$0xff]  ;;  %v46_v1 = vld [vmem:[%s591_s1 + $0x8] sm:$0xff]  ;;  %v47_v2 = vld [vmem:[%s591_s1 + $0x10] sm:$0xff]  ;;  %392 = vmatprep.subr.bf16.mxu1 %v422_v51  ;;  %408 = vmatprep.mubr.msk.bf16.mxu1 %vm423_vm2, %v422_v51  ;;  %v424_v52 = vmov 0   ;;  %vm250_vm3 = vcmask 818176   ;;  %vm318_vm4 = vcmask 1044480  }
   0x2   :  { %v49_v3 = vpack.c.bf16 %v46_v1, %v45_v0  ;;  %v48_v4 = vld [vmem:[%s591_s1 + $0x18] sm:$0xf]  ;;  %v21_v5 = vld [vmem:[%s592_s0] sm:$0xff]  ;;  %v22_v6 = vld [vmem:[%s592_s0 + $0x8] sm:$0xff]  ;;  %416 = vset.pattern.permute.xlu1 %v424_v52 }
   0x3   :  { %v50_v7 = vpack.c.bf16 %v48_v4, %v47_v2  ;;  %v37_v8 = vpack.c.bf16 %v22_v6, %v21_v5  ;;  %v23_v9 = vld [vmem:[%s592_s0 + $0x10] sm:$0xff]  ;;  %v24_v10 = vld [vmem:[%s592_s0 + $0x18] sm:$0xff]  ;;  %v25_v12 = vld [vmem:[%s592_s0 + $0x20] sm:$0xff] }
   0x4   :  { %372 = vmatprep.subr.bf16.mxu0 %v49_v3  ;;  %v26_v13 = vld [vmem:[%s592_s0 + $0x28] sm:$0xff]  ;;  %v51_v14 = vld [vmem:[%s593_s3] sm:$0xff]  ;;  %v38_v15 = vpack.c.bf16 %v24_v10, %v23_v9  ;;  %v53_v17 = vld [vmem:[%s593_s3 + $0x10] sm:$0xff] }
   0x5   :  { %373 = vmatpush3.bf16.msra.mxu0 %v49_v3  ;;  %376 = vmatprep.mubr.msk.bf16.mxu0 %vm79_vm0, %v37_v8  ;;  %v106_v11 = vsel %vm104_vm1, %v50_v7, 0  ;;  %v52_v16 = vld [vmem:[%s593_s3 + $0x8] sm:$0xff]  ;;  %v54_v18 = vld [vmem:[%s593_s3 + $0x18] sm:$0xff]  ;;  %v39_v19 = vpack.c.bf16 %v26_v13, %v25_v12  ;;  %v55_v22 = vld [vmem:[%s593_s3 + $0x20] sm:$0xff] }
   0x6   :  { %412 = vmatprep.subr.msk.bf16.mxu0 %vm104_vm1, %v50_v7  ;;  %v64_v20 = vpack.c.bf16 %v52_v16, %v51_v14  ;;  %v65_v21 = vpack.c.bf16 %v54_v18, %v53_v17  ;;  %v56_v23 = vld [vmem:[%s593_s3 + $0x28] sm:$0xff]  ;;  %v27_v24 = vld [vmem:[%s592_s0 + $0x30] sm:$0xff]  ;;  %v28_v25 = vld [vmem:[%s592_s0 + $0x38] sm:$0xff] }
   0x7   :  { %v29_v26 = vld [vmem:[%s592_s0 + $0x40] sm:$0xff]  ;;  %v30_v27 = vld [vmem:[%s592_s0 + $0x48] sm:$0xff]  ;;  %v66_v28 = vpack.c.bf16 %v56_v23, %v55_v22  ;;  %v40_v29 = vpack.c.bf16 %v28_v25, %v27_v24  ;;  %v57_v30 = vld [vmem:[%s593_s3 + $0x30] sm:$0xff] }
   0x8   :  { %234 = vxpose.xlu0.c.b16.start [1/7] (short) (narrow) %v64_v20, 16  ;;  %v58_v31 = vld [vmem:[%s593_s3 + $0x38] sm:$0xff]  ;;  %v41_v32 = vpack.c.bf16 %v30_v27, %v29_v26  ;;  %v59_v34 = vld [vmem:[%s593_s3 + $0x40] sm:$0xff]  ;;  %v60_v35 = vld [vmem:[%s593_s3 + $0x48] sm:$0xff] }
   0x9   :  { %375 = vmatpush3.bf16.msra.mxu0 %v106_v11  ;;  %v67_v33 = vpack.c.bf16 %v58_v31, %v57_v30  ;;  %v31_v36 = vld [vmem:[%s592_s0 + $0x50] sm:$0xff]  ;;  %v32_v37 = vld [vmem:[%s592_s0 + $0x58] sm:$0xff]  ;;  %v33_v38 = vld [vmem:[%s592_s0 + $0x60] sm:$0xff]  ;;  %v68_v40 = vpack.c.bf16 %v60_v35, %v59_v34 }
   0xa   :  { %v34_v39 = vld [vmem:[%s592_s0 + $0x68] sm:$0xff]  ;;  %v42_v41 = vpack.c.bf16 %v32_v37, %v31_v36  ;;  %v61_v42 = vld [vmem:[%s593_s3 + $0x50] sm:$0xff]  ;;  %v62_v43 = vld [vmem:[%s593_s3 + $0x58] sm:$0xff] }
   0xb   :  { %v43_v44 = vpack.c.bf16 %v34_v39, %v33_v38  ;;  %v69_v45 = vpack.c.bf16 %v62_v43, %v61_v42  ;;  %v63_v46 = vld [vmem:[%s593_s3 + $0x60] sm:$0xf]  ;;  %v35_v47 = vld [vmem:[%s592_s0 + $0x70] sm:$0xff]  ;;  %v36_v48 = vld [vmem:[%s592_s0 + $0x78] sm:$0xff] }
   0xc   :  { %377 = vmatmul.mubr.msk.bf16.vlgmr.msra.gmra.mrb[0].mxu0 %vm79_vm0, %v38_v15  ;;  %235 = vxpose.xlu0.c.b16.cont [2/7] (short) (narrow) %v65_v21, 16  ;;  %v70_v49 = vpack.c.bf16 %v63_v46, %v63_v46  ;;  %v44_v50 = vpack.c.bf16 %v36_v48, %v35_v47  ;;  %v72_v53 = vld [vmem:[%s594_s4] sm:$0x1f] }
   0xd   :  { %380 = vmatprep.mubr.msk.bf16.mxu0 %vm79_vm0, %v39_v19  ;;  %231 = vperm.xlu1 %416, %v72_v53   ;;  %v343_v54 = vld [vmem:[%s595_s2] ss:$0 sm:$0xff] }
  0x10   :  { %236 = vxpose.xlu0.c.b16.cont [3/7] (short) (narrow) %v66_v28, 16 }
  0x14   :  { %381 = vmatmul.mubr.msk.bf16.gmra.mrb[4].mxu0 %vm79_vm0, %v40_v29  ;;  %237 = vxpose.xlu0.c.b16.cont [4/7] (short) (narrow) %v67_v33, 16 }
  0x15   :  { %384 = vmatprep.mubr.msk.bf16.mxu0 %vm79_vm0, %v41_v32 }
  0x18   :  { %238 = vxpose.xlu0.c.b16.cont [5/7] (short) (narrow) %v68_v40, 16 }
  0x1c   :  { %385 = vmatmul.mubr.msk.bf16.gmra.mrb[8].mxu0 %vm79_vm0, %v42_v41  ;;  %239 = vxpose.xlu0.c.b16.cont [6/7] (short) (narrow) %v69_v45, 16 }
  0x1d   :  { %388 = vmatprep.mubr.msk.bf16.mxu0 %vm79_vm0, %v43_v44 }
  0x20   :  { %240 = vxpose.xlu0.c.b16.end [7/7] (short) (narrow) %v70_v49, 16 }
  0x24   :  { %389 = vmatmul.mubr.msk.bf16.gmra.mrb[12].mxu0 %vm79_vm0, %v44_v50 }
  0x29   :  { %417 = vset.pattern.permute.xlu0 %v424_v52 }
  0xdf   :  { %v378_v55 = vpop.f32.mrb[0].mxu0 }
  0xe0   :  { %v151_v56 = vadd.f32 %v378_v55, %v343_v54  ;;  %v142_v57 = vpop.f32.mrb[1].mxu0 }
  0xe1   :  { %v143_v58 = vadd.f32 %v343_v54, %v142_v57  ;;  %v379_v59 = vpop.f32.mrb[2].mxu0  ;;  %v232_v57 = vpop.permute.xlu1 %231 }
  0xe2   :  { %v154_v60 = vadd.f32 %v379_v59, %v343_v54  ;;  %v145_v61 = vpop.f32.mrb[3].mxu0  ;;  %v207_v63 = vmax.f32 %v151_v56, 0.0  ;;  %v242_v56 = vpop.trf.xlu0 }
  0xe3   :  { %v146_v62 = vadd.f32 %v343_v54, %v145_v61  ;;  %v205_v1 = vmax.f32 %v143_v58, 0.0 }
  0xe4   :  { %v208_v0 = vmax.f32 %v154_v60, 0.0 }
  0xe5   :  { %v206_v2 = vmax.f32 %v146_v62, 0.0 }
  0xe6   :  { %v222_v3 = vpack.c.bf16 %v208_v0, %v207_v63 }
  0xe7   :  { %v221_v4 = vpack.c.bf16 %v206_v2, %v205_v1  ;;  %v382_v5 = vpop.f32.mrb[4].mxu0 }
  0xe8   :  { %v167_v6 = vadd.f32 %v382_v5, %v343_v54  ;;  %v158_v7 = vpop.f32.mrb[5].mxu0  ;;  %v258_v23 = vsel %vm250_vm3, %v222_v3, 0 }
  0xe9   :  { %v255_v8 = vsel %vm250_vm3, %v221_v4, 0  ;;  %v159_v9 = vadd.f32 %v343_v54, %v158_v7  ;;  %v383_v10 = vpop.f32.mrb[6].mxu0 }
  0xea   :  { %393 = vmatpush3.bf16.xpose.msra.mxu1 %v255_v8  ;;  %v211_v11 = vmax.f32 %v167_v6, 0.0  ;;  %v170_v12 = vadd.f32 %v383_v10, %v343_v54  ;;  %v161_v13 = vpop.f32.mrb[7].mxu0 }
  0xeb   :  { %v209_v14 = vmax.f32 %v159_v9, 0.0  ;;  %v162_v15 = vadd.f32 %v343_v54, %v161_v13  ;;  %394 = vmatprep.subr.bf16.mxu1 %v422_v51 }
  0xec   :  { %v212_v16 = vmax.f32 %v170_v12, 0.0 }
  0xed   :  { %v210_v17 = vmax.f32 %v162_v15, 0.0 }
  0xee   :  { %v224_v18 = vpack.c.bf16 %v212_v16, %v211_v11 }
  0xef   :  { %v223_v19 = vpack.c.bf16 %v210_v17, %v209_v14  ;;  %v386_v20 = vpop.f32.mrb[8].mxu0 }
  0xf0   :  { %v183_v21 = vadd.f32 %v386_v20, %v343_v54  ;;  %v174_v22 = vpop.f32.mrb[9].mxu0  ;;  %v264_v50 = vsel %vm250_vm3, %v224_v18, 0 }
  0xf1   :  { %v175_v24 = vadd.f32 %v343_v54, %v174_v22  ;;  %v387_v25 = vpop.f32.mrb[10].mxu0  ;;  %v261_v38 = vsel %vm250_vm3, %v223_v19, 0 }
  0xf2   :  { %395 = vmatpush3.bf16.xpose.msra.mxu1 %v258_v23  ;;  %v215_v26 = vmax.f32 %v183_v21, 0.0  ;;  %v186_v27 = vadd.f32 %v387_v25, %v343_v54  ;;  %v177_v28 = vpop.f32.mrb[11].mxu0 }
  0xf3   :  { %396 = vmatprep.subr.bf16.mxu1 %v422_v51  ;;  %v213_v29 = vmax.f32 %v175_v24, 0.0  ;;  %v178_v30 = vadd.f32 %v343_v54, %v177_v28 }
  0xf4   :  { %v216_v31 = vmax.f32 %v186_v27, 0.0 }
  0xf5   :  { %v214_v32 = vmax.f32 %v178_v30, 0.0 }
  0xf6   :  { %v226_v33 = vpack.c.bf16 %v216_v31, %v215_v26 }
  0xf7   :  { %v225_v34 = vpack.c.bf16 %v214_v32, %v213_v29  ;;  %v390_v35 = vpop.f32.mrb[12].mxu0 }
  0xf8   :  { %v199_v36 = vadd.f32 %v390_v35, %v343_v54  ;;  %v190_v37 = vpop.f32.mrb[13].mxu0  ;;  %v270_v53 = vsel %vm250_vm3, %v226_v33, 0 }
  0xf9   :  { %v191_v39 = vadd.f32 %v343_v54, %v190_v37  ;;  %v391_v40 = vpop.f32.mrb[14].mxu0  ;;  %v267_v52 = vsel %vm250_vm3, %v225_v34, 0 }
  0xfa   :  { %397 = vmatpush3.bf16.xpose.msra.mxu1 %v261_v38  ;;  %v219_v41 = vmax.f32 %v199_v36, 0.0  ;;  %v202_v42 = vadd.f32 %v391_v40, %v343_v54  ;;  %v193_v43 = vpop.f32.mrb[15].mxu0 }
  0xfb   :  { %398 = vmatprep.subr.bf16.mxu1 %v422_v51  ;;  %v217_v44 = vmax.f32 %v191_v39, 0.0  ;;  %v194_v45 = vadd.f32 %v343_v54, %v193_v43 }
  0xfc   :  { %v220_v46 = vmax.f32 %v202_v42, 0.0 }
  0xfd   :  { %v218_v47 = vmax.f32 %v194_v45, 0.0 }
  0xfe   :  { %v228_v48 = vpack.c.bf16 %v220_v46, %v219_v41 }
  0xff   :  { %v227_v49 = vpack.c.bf16 %v218_v47, %v217_v44 }
 0x100   :  { %v276_v55 = vsel %vm250_vm3, %v228_v48, 0 }
 0x101   :  { %v273_v54 = vsel %vm250_vm3, %v227_v49, 0 }
 0x102   :  { %399 = vmatpush3.bf16.xpose.msra.mxu1 %v264_v50 }
 0x103   :  { %400 = vmatprep.subr.bf16.mxu1 %v422_v51 }
 0x10a   :  { %401 = vmatpush3.bf16.xpose.msra.mxu1 %v267_v52 }
 0x10b   :  { %402 = vmatprep.subr.bf16.mxu1 %v422_v51 }
 0x112   :  { %403 = vmatpush3.bf16.xpose.msra.mxu1 %v270_v53 }
 0x113   :  { %404 = vmatprep.subr.bf16.mxu1 %v422_v51 }
 0x11a   :  { %405 = vmatpush3.bf16.xpose.msra.mxu1 %v273_v54 }
 0x11b   :  { %406 = vmatprep.subr.bf16.mxu1 %v422_v51 }
 0x122   :  { %407 = vmatpush3.bf16.xpose.msra.mxu1 %v276_v55 }
 0x129   :  { %409 = vmatmul.mubr.msk.bf16.vlgmr.msra.gmra.mrb[0].mxu1 %vm250_vm3, %v242_v56 }
 0x1fc   :  { %v312_v58 = vpop.f32.mrb[0].mxu1 }
 0x1fd   :  { %v313_v59 = vadd.f32 %v312_v58, %v232_v57  ;;  %v410_v60 = vpop.f32.mrb[1].mxu1 }
 0x1fe   :  { %v315_v61 = vpop.f32.mrb[2].mxu1 }
 0x1ff   :  { %v319_v62 = vsel %vm318_vm4, %v313_v59, -inf  ;;  %v411_v63 = vpop.f32.mrb[3].mxu1 }
 0x200   :  { %v320_v0 = vrot.slane %v319_v62, 4 }
 0x202   :  { %v321_v1 = vmax.f32 %v319_v62, %v320_v0 }
 0x204   :  { %v322_v2 = vrot.slane %v321_v1, 2 }
 0x206   :  { %v323_v3 = vmax.f32 %v321_v1, %v322_v2 }
 0x208   :  { %v324_v51 = vrot.slane %v323_v3, 1 }
 0x20a   :  { %v325_v4 = vmax.f32 %v323_v3, %v324_v51 }
 0x20c   :  { %v326_v5 = vsub.f32 %v313_v59, %v325_v4 }
 0x20e   :  { %v327_v6 = vmul.f32 1.442695, %v326_v5 }
 0x210   :  { %418 = vpow2.f32 %v327_v6 }
 0x21a   :  { %v419_v7 = vpop.eup %418 }
 0x21b   :  { %v329_v8 = vsel %vm318_vm4, %v419_v7, 0.0 }
 0x21c   :  { %v330_v9 = vrot.slane %v329_v8, 4 }
 0x21e   :  { %v331_v10 = vadd.f32 %v330_v9, %v329_v8 }
 0x220   :  { %v332_v11 = vrot.slane %v331_v10, 2 }
 0x222   :  { %v333_v12 = vadd.f32 %v332_v11, %v331_v10 }
 0x224   :  { %v334_v13 = vrot.slane %v333_v12, 1 }
 0x226   :  { %v335_v14 = vadd.f32 %v334_v13, %v333_v12 }
 0x228   :  { %420 = vrcp.f32 %v335_v14 }
 0x232   :  { %v421_v15 = vpop.eup %420 }
 0x233   :  { %v337_v16 = vmul.f32 %v421_v15, %v419_v7 }
 0x235   :  { %338 = vst [vmem:[%s596_s5] sm:$0x1f] %v337_v16 }

</bundles_post_ra>
